<compile_context>
chip_gen: v7x
topology: tpu7x:2x2x1
jax: 0.10.0
libtpu: 0.0.40
codegen_flags: <defaults>
</compile_context>

<pallas_src>
import functools

import jax
import jax.numpy as jnp
from jax import lax
from jax.experimental import pallas as pl
from jax.experimental.pallas import tpu as pltpu


def _round_up(x, m):
    return (x + m - 1) // m * m


def _vmem_budgets():
    """Generation-aware VMEM knobs (v5e/v6e: 128 MiB physical, v7x: 64 MiB)."""
    cap = 64 * 1024 * 1024                     # conservative (v7x-sized) fallback
    try:
        info = pltpu.get_tpu_info()
        cap = int(getattr(info, "vmem_capacity_bytes", cap) or cap)
    except Exception:
        pass
    vmem_limit = min((cap * 3) // 4, 96 * 1024 * 1024)  # 96 MiB v5e/v6e, 48 MiB v7x
    input_budget = vmem_limit // 2
    return vmem_limit, input_budget


def _pick_tile_hw(hw, c, itemsize, *, max_tile=32768, input_vmem_budget=None):
    """Pick a lane tile (multiple of 128) sized against the VMEM budget.

    Big tiles amortize the per-grid-step overhead (the dominant cost for this
    HBM-bound kernel when C is small).  The budget accounts for the
    double-buffered input DMA tiles plus the in-kernel f32 temporaries.
    """
    if input_vmem_budget is None:
        input_vmem_budget = _vmem_budgets()[1]
    per_col = 2 * (c * itemsize + 4)     # 2 DMA buffers x (logits col + i32 target)
    per_col += 2 * c * 4 + 8 * 4         # f32 cast + exp temporaries + small vectors
    cap = max(128, (input_vmem_budget // per_col) // 128 * 128)
    tile = min(max_tile, cap, _round_up(hw, 128))
    return max(128, (tile // 128) * 128)


def _tile_loss(logits_ref, targets_ref, *, alpha, gamma):
    """Per-pixel focal loss for one (C, tile_hw) block. Returns (1, tile_hw) f32."""
    x = logits_ref[0].astype(jnp.float32)          # (C, tile_hw)  f32 compute (v5e-safe)
    t = targets_ref[0]                             # (1, tile_hw)  int32

    # Numerically stable softmax pieces over the class (sublane) axis.  Only the
    # (1, tile_hw) target-class probability is ever materialized.
    m = jnp.max(x, axis=0, keepdims=True)          # (1, tile_hw)
    e = jnp.exp(x - m)                             # (C, tile_hw)  (EUP)
    s = jnp.sum(e, axis=0, keepdims=True)          # (1, tile_hw)

    # where-based gather: compare + select + reduce; no int->f32 convert and no
    # full-size one-hot multiply (lower VPU/vreg pressure).
    class_ids = lax.broadcasted_iota(jnp.int32, x.shape, 0)
    e_t = jnp.sum(jnp.where(class_ids == t, e, 0.0), axis=0, keepdims=True)

    p_t = jnp.maximum(e_t / s, 1e-10)              # clamp(min=1e-10) as in the spec
    omp = 1.0 - p_t
    if float(gamma).is_integer():
        focal = lax.integer_pow(omp, int(gamma))   # gamma=2 -> single VPU multiply
    else:
        focal = omp ** gamma
    log_p = jnp.log(p_t + 1e-10)
    return (-alpha) * focal * log_p                # (1, tile_hw)


def _focal_sum_kernel(logits_ref, targets_ref, out_ref, *,
                      alpha, gamma, hw_valid, tile_hw, n_inner, num_tiles,
                      needs_mask):
    """Accumulates a per-lane partial-loss vector per (batch, outer) slot."""
    i = pl.program_id(2)

    @pl.when(i == 0)
    def _():
        out_ref[...] = jnp.zeros_like(out_ref)

    loss = _tile_loss(logits_ref, targets_ref, alpha=alpha, gamma=gamma)

    if not needs_mask:
        out_ref[0] += loss                         # pure VPU adds; no per-step XLU reduce
        return

    # Only the final logical pixel tile contains out-of-bounds (garbage)
    # columns; every other tile takes the unmasked fast path.
    tile_idx = pl.program_id(1) * n_inner + i
    is_last = tile_idx == num_tiles - 1

    @pl.when(jnp.logical_not(is_last))
    def _():
        out_ref[0] += loss

    @pl.when(is_last)
    def _():
        col = tile_idx * tile_hw + lax.broadcasted_iota(jnp.int32, loss.shape, 1)
        out_ref[0] += jnp.where(col < hw_valid, loss, 0.0)


def _focal_map_kernel(logits_ref, targets_ref, out_ref, *, alpha, gamma):
    """Writes the per-pixel loss map (reduction='none').

    No tail masking needed: on a partial edge block Pallas only writes the
    in-bounds window back to HBM, so garbage tail columns never escape VMEM.
    """
    out_ref[0] = _tile_loss(logits_ref, targets_ref, alpha=alpha, gamma=gamma)


def focal_loss(logits_nchw, targets_nhw, *, alpha=1.0, gamma=2.0,
               reduction="mean", tile_hw=None):
    """Pallas implementation of FocalLoss.forward (scalar-alpha path)."""
    # TODO(synk): tensor-valued (per-class) alpha gather path not implemented.
    N, C, H, W = logits_nchw.shape
    HW = H * W
    M = N * HW

    # NCHW -> (N, C, HW) is a pure reshape (no transpose, no extra HBM pass).
    # Keep the input dtype (e.g. bf16) all the way to VMEM; cast in-kernel.
    logits_rows = logits_nchw.reshape(N, C, HW)
    target_rows = targets_nhw.reshape(N, 1, HW).astype(jnp.int32)

    itemsize = jnp.dtype(logits_nchw.dtype).itemsize
    vmem_limit, input_budget = _vmem_budgets()
    if tile_hw is None:
        tile_hw = _pick_tile_hw(HW, C, itemsize, input_vmem_budget=input_budget)

    num_tiles = pl.cdiv(HW, tile_hw)
    needs_mask = (HW % tile_hw) != 0

    cost = pl.CostEstimate(
        flops=int(12 * M * C),
        transcendentals=int(M * C + 2 * M),
        bytes_accessed=int(M * C * itemsize + 2 * M * 4),
    )

    if reduction in ("mean", "sum"):
        # Split the pixel-tile axis into (parallel outer, arbitrary inner) so
        # v7x's two TensorCores both get work even for batch-1 inputs.  Only
        # split when it divides num_tiles exactly, keeping every block index
        # in range (no effect on v5e/v6e's single core).
        n_outer = 2 if (num_tiles >= 2 and num_tiles % 2 == 0) else 1
        n_inner = num_tiles // n_outer

        kernel = functools.partial(
            _focal_sum_kernel, alpha=float(alpha), gamma=float(gamma),
            hw_valid=HW, tile_hw=tile_hw, n_inner=n_inner, num_tiles=num_tiles,
            needs_mask=needs_mask)

        partials = pl.pallas_call(
            kernel,
            out_shape=jax.ShapeDtypeStruct((N * n_outer, 1, tile_hw), jnp.float32),
            grid_spec=pltpu.PrefetchScalarGridSpec(
                num_scalar_prefetch=0,
                grid=(N, n_outer, n_inner),
                in_specs=[
                    pl.BlockSpec((1, C, tile_hw),
                                 lambda n, o, i: (n, 0, o * n_inner + i)),
                    pl.BlockSpec((1, 1, tile_hw),
                                 lambda n, o, i: (n, 0, o * n_inner + i)),
                ],
                # Same block index across the inner (reduction) axis -> resident
                # per-(batch, outer) accumulator; batch and outer are parallel.
                out_specs=pl.BlockSpec((1, 1, tile_hw),
                                       lambda n, o, i: (n * n_outer + o, 0, 0)),
            ),
            compiler_params=pltpu.CompilerParams(
                dimension_semantics=("parallel", "parallel", "arbitrary"),
                vmem_limit_bytes=vmem_limit),
            cost_estimate=cost,
        )(logits_rows, target_rows)

        total = jnp.sum(partials, dtype=jnp.float32)
        if reduction == "mean":
            return total / jnp.float32(M)
        return total

    # PyTorch's else-branch: return the per-pixel loss map.
    kernel = functools.partial(_focal_map_kernel,
                               alpha=float(alpha), gamma=float(gamma))
    loss_map = pl.pallas_call(
        kernel,
        out_shape=jax.ShapeDtypeStruct((N, 1, HW), jnp.float32),
        grid_spec=pltpu.PrefetchScalarGridSpec(
            num_scalar_prefetch=0,
            grid=(N, num_tiles),
            in_specs=[
                pl.BlockSpec((1, C, tile_hw), lambda n, j: (n, 0, j)),
                pl.BlockSpec((1, 1, tile_hw), lambda n, j: (n, 0, j)),
            ],
            out_specs=pl.BlockSpec((1, 1, tile_hw), lambda n, j: (n, 0, j)),
        ),
        compiler_params=pltpu.CompilerParams(
            dimension_semantics=("parallel", "parallel"),
            vmem_limit_bytes=vmem_limit),
        cost_estimate=cost,
    )(logits_rows, target_rows)
    return loss_map.reshape(N, H, W)


def _reference_focal_loss(logits_nchw, targets_nhw, alpha=1.0, gamma=2.0,
                          reduction="mean"):
    probs = jax.nn.softmax(logits_nchw, axis=1)
    C = logits_nchw.shape[1]
    onehot = jax.nn.one_hot(targets_nhw, C, dtype=probs.dtype)   # N,H,W,C
    onehot = jnp.transpose(onehot, (0, 3, 1, 2))                 # N,C,H,W
    p_t = jnp.maximum(jnp.sum(probs * onehot, axis=1), 1e-10)
    focal = (1.0 - p_t) ** gamma
    logp = jnp.log(p_t + 1e-10)
    loss = -alpha * focal * logp
    if reduction == "mean":
        return jnp.mean(loss)
    if reduction == "sum":
        return jnp.sum(loss)
    return loss


if __name__ == "__main__":
    key = jax.random.PRNGKey(0)
    k_logits, k_targets = jax.random.split(key)

    N, C, H, W = 2, 4, 16, 16
    logits = jax.random.normal(k_logits, (N, C, H, W), dtype=jnp.float32)
    targets = jax.random.randint(k_targets, (N, H, W), 0, C, dtype=jnp.int32)

    out = jax.block_until_ready(focal_loss(logits, targets, alpha=1.0,
                                           gamma=2.0, reduction="mean"))
    ref = _reference_focal_loss(logits, targets)
    assert jnp.allclose(out, ref, rtol=1e-5, atol=1e-6), (out, ref)

    # sum reduction
    out_sum = jax.block_until_ready(focal_loss(logits, targets, reduction="sum"))
    ref_sum = _reference_focal_loss(logits, targets, reduction="sum")
    assert jnp.allclose(out_sum, ref_sum, rtol=1e-5, atol=1e-5), (out_sum, ref_sum)

    # 'none' reduction -> per-pixel loss map with PyTorch shape semantics
    out_map = jax.block_until_ready(focal_loss(logits, targets, reduction="none"))
    ref_map = _reference_focal_loss(logits, targets, reduction="none")
    assert out_map.shape == (N, H, W), out_map.shape
    assert jnp.allclose(out_map, ref_map, rtol=1e-5, atol=1e-6)

    # Forced small tile: exercises the multi-tile accumulation path and the
    # (parallel) pixel-axis split used for v7x megacore utilization.
    out_t = jax.block_until_ready(
        focal_loss(logits, targets, reduction="mean", tile_hw=128))
    assert jnp.allclose(out_t, ref, rtol=1e-5, atol=1e-6), (out_t, ref)

    # Non-divisible H*W: exercises partial edge blocks + last-tile-only masking
    # (no wrapper-side padding pass).
    N2, C2, H2, W2 = 1, 3, 10, 13          # HW = 130, not a multiple of 128
    logits2 = jax.random.normal(jax.random.PRNGKey(1), (N2, C2, H2, W2),
                                dtype=jnp.float32)
    targets2 = jax.random.randint(jax.random.PRNGKey(2), (N2, H2, W2), 0, C2,
                                  dtype=jnp.int32)
    out2 = jax.block_until_ready(
        focal_loss(logits2, targets2, reduction="mean", tile_hw=128))
    ref2 = _reference_focal_loss(logits2, targets2)
    assert jnp.allclose(out2, ref2, rtol=1e-5, atol=1e-6), (out2, ref2)

    out2_map = jax.block_until_ready(
        focal_loss(logits2, targets2, reduction="none", tile_hw=128))
    ref2_map = _reference_focal_loss(logits2, targets2, reduction="none")
    assert out2_map.shape == (N2, H2, W2), out2_map.shape
    assert jnp.allclose(out2_map, ref2_map, rtol=1e-5, atol=1e-6)

    print("KERNEL_OK")
</pallas_src>

<mosaic_0001>
module attributes {stable_mosaic.version = 11 : i64} {
  func.func @_focal_sum_kernel(%arg0: i32, %arg1: i32, %arg2: i32, %arg3: memref<1x4x256xf32, #tpu.memory_space<vmem>>, %arg4: memref<1x1x256xi32, #tpu.memory_space<vmem>>, %arg5: memref<1x1x256xf32, #tpu.memory_space<vmem>>) attributes {dimension_semantics = [#tpu.dimension_semantics<parallel>, #tpu.dimension_semantics<parallel>, #tpu.dimension_semantics<arbitrary>], iteration_bounds = array<i64: 2, 1, 1>, scalar_prefetch = 0 : i64, scratch_operands = 0 : i64, tpu.core_type = #tpu.core_type<tc>, window_params = [{transform_indices = @transform_0, window_bounds = array<i64: 1, 4, 256>}, {transform_indices = @transform_1, window_bounds = array<i64: 1, 1, 256>}, {transform_indices = @transform_2, window_bounds = array<i64: 1, 1, 256>}]} {
    %c0_i32 = arith.constant 0 : i32
    %0 = arith.cmpi eq, %arg2, %c0_i32 : i32
    %1 = arith.extui %0 : i1 to i32
    %c0_i32_0 = arith.constant 0 : i32
    %2 = arith.cmpi ne, %1, %c0_i32_0 : i32
    scf.if %2 {
      %cst_19 = arith.constant 0.000000e+00 : f32
      %39 = vector.broadcast %cst_19 : f32 to vector<1x1x256xf32>
      %c0_20 = arith.constant 0 : index
      %c0_21 = arith.constant 0 : index
      %c0_22 = arith.constant 0 : index
      %40 = vector.load %arg5[%c0_20, %c0_21, %c0_22] : memref<1x1x256xf32, #tpu.memory_space<vmem>>, vector<1x1x256xf32>
      tpu.vector_store %arg5[%c0_20, %c0_21, %c0_22], %39 {strides = array<i32>} : memref<1x1x256xf32, #tpu.memory_space<vmem>>, vector<1x1x256xf32>,
    } else {
    }
    %c0 = arith.constant 0 : index
    %c0_1 = arith.constant 0 : index
    %c0_2 = arith.constant 0 : index
    %3 = vector.load %arg3[%c0, %c0_1, %c0_2] : memref<1x4x256xf32, #tpu.memory_space<vmem>>, vector<1x4x256xf32>
    %4 = vector.shape_cast %3 : vector<1x4x256xf32> to vector<4x256xf32>
    %c0_3 = arith.constant 0 : index
    %c0_4 = arith.constant 0 : index
    %c0_5 = arith.constant 0 : index
    %5 = vector.load %arg4[%c0_3, %c0_4, %c0_5] : memref<1x1x256xi32, #tpu.memory_space<vmem>>, vector<1x1x256xi32>
    %6 = vector.shape_cast %5 : vector<1x1x256xi32> to vector<1x256xi32>
    %cst = arith.constant dense<0xFF800000> : vector<256xf32>
    %7 = vector.multi_reduction <maximumf>, %4, %cst [0] : vector<4x256xf32> to vector<256xf32>
    %8 = vector.shape_cast %7 : vector<256xf32> to vector<1x256xf32>
    %9 = vector.broadcast %8 : vector<1x256xf32> to vector<4x256xf32>
    %10 = arith.subf %4, %9 : vector<4x256xf32>
    %11 = math.exp %10 : vector<4x256xf32>
    %cst_6 = arith.constant dense<0.000000e+00> : vector<256xf32>
    %12 = vector.multi_reduction <add>, %11, %cst_6 [0] : vector<4x256xf32> to vector<256xf32>
    %13 = vector.shape_cast %12 : vector<256xf32> to vector<1x256xf32>
    %14 = tpu.iota {dimensions = array<i32: 0>} : vector<4x256xi32>
    %15 = vector.broadcast %6 : vector<1x256xi32> to vector<4x256xi32>
    %16 = arith.cmpi eq, %14, %15 : vector<4x256xi32>
    %cst_7 = arith.constant 0.000000e+00 : f32
    %17 = vector.broadcast %cst_7 : f32 to vector<4x256xf32>
    %18 = arith.select %16, %11, %17 : vector<4x256xi1>, vector<4x256xf32>
    %cst_8 = arith.constant dense<0.000000e+00> : vector<256xf32>
    %19 = vector.multi_reduction <add>, %18, %cst_8 [0] : vector<4x256xf32> to vector<256xf32>
    %20 = vector.shape_cast %19 : vector<256xf32> to vector<1x256xf32>
    %21 = arith.divf %20, %13 : vector<1x256xf32>
    %cst_9 = arith.constant 1.000000e-10 : f32
    %22 = vector.broadcast %cst_9 : f32 to vector<1x256xf32>
    %23 = arith.maximumf %21, %22 : vector<1x256xf32>
    %cst_10 = arith.constant 1.000000e+00 : f32
    %24 = vector.broadcast %cst_10 : f32 to vector<1x256xf32>
    %25 = arith.subf %24, %23 : vector<1x256xf32>
    %26 = arith.mulf %25, %25 : vector<1x256xf32>
    %cst_11 = arith.constant 1.000000e-10 : f32
    %27 = vector.broadcast %cst_11 : f32 to vector<1x256xf32>
    %28 = arith.addf %23, %27 : vector<1x256xf32>
    %29 = math.log %28 : vector<1x256xf32>
    %cst_12 = arith.constant -1.000000e+00 : f32
    %30 = vector.broadcast %cst_12 : f32 to vector<1x256xf32>
    %31 = arith.mulf %30, %26 : vector<1x256xf32>
    %32 = arith.mulf %31, %29 : vector<1x256xf32>
    %c0_13 = arith.constant 0 : index
    %c0_14 = arith.constant 0 : index
    %c0_15 = arith.constant 0 : index
    %33 = vector.load %arg5[%c0_13, %c0_14, %c0_15] : memref<1x1x256xf32, #tpu.memory_space<vmem>>, vector<1x1x256xf32>
    %34 = vector.shape_cast %33 : vector<1x1x256xf32> to vector<1x256xf32>
    %35 = arith.addf %34, %32 : vector<1x256xf32>
    %c0_16 = arith.constant 0 : index
    %c0_17 = arith.constant 0 : index
    %c0_18 = arith.constant 0 : index
    %36 = vector.load %arg5[%c0_16, %c0_17, %c0_18] : memref<1x1x256xf32, #tpu.memory_space<vmem>>, vector<1x1x256xf32>
    %37 = vector.shape_cast %36 : vector<1x1x256xf32> to vector<1x256xf32>
    %38 = vector.shape_cast %35 : vector<1x256xf32> to vector<1x1x256xf32>
    tpu.vector_store %arg5[%c0_16, %c0_17, %c0_18], %38 {strides = array<i32>} : memref<1x1x256xf32, #tpu.memory_space<vmem>>, vector<1x1x256xf32>,
    return
  }
  func.func @transform_0(%arg0: i32, %arg1: i32, %arg2: i32) -> (i32, i32, i32) {
    %c1_i32 = arith.constant 1 : i32
    %0 = arith.muli %arg1, %c1_i32 : i32
    %1 = arith.addi %0, %arg2 : i32
    %c0_i32 = arith.constant 0 : i32
    %c0_i32_0 = arith.constant 0 : i32
    return %arg0, %c0_i32, %1 : i32, i32, i32
  }
  func.func @transform_1(%arg0: i32, %arg1: i32, %arg2: i32) -> (i32, i32, i32) {
    %c1_i32 = arith.constant 1 : i32
    %0 = arith.muli %arg1, %c1_i32 : i32
    %1 = arith.addi %0, %arg2 : i32
    %c0_i32 = arith.constant 0 : i32
    %c0_i32_0 = arith.constant 0 : i32
    return %arg0, %c0_i32, %1 : i32, i32, i32
  }
  func.func @transform_2(%arg0: i32, %arg1: i32, %arg2: i32) -> (i32, i32, i32) {
    %c1_i32 = arith.constant 1 : i32
    %0 = arith.muli %arg0, %c1_i32 : i32
    %1 = arith.addi %0, %arg1 : i32
    %c0_i32 = arith.constant 0 : i32
    %c0_i32_0 = arith.constant 0 : i32
    %c0_i32_1 = arith.constant 0 : i32
    return %1, %c0_i32, %c0_i32_0 : i32, i32, i32
  }
}

</mosaic_0001>

<bundles_post_ra>
// kernel: tpu_custom_call.1
= control target key start
LH: loop header
LB: loop body
LE: loop exit
PB: predicated region body
PF: predicated region fallthrough
CT: control target
= control target key end

     0   :  { %7 = vsyncpa [#allocation3], 0  ;;  %s1008_s0 = inlined_call_operand.hbm [shape: f32[2,4,256], index: 0, kind: input, shape index: {}]   ;;  %s1009_s1 = inlined_call_operand.hbm [shape: s32[2,1,256], index: 1, kind: input, shape index: {}]   ;;  %s1010_s2 = inlined_call_operand.hbm [shape: f32[2,1,256], index: 2, kind: output, shape index: {}]  }
   0x1   :  { %9 = vsyncpa [#allocation3 + $0x1], 0 }
   0x2   :  { %10 = vsyncpa [#allocation6], 0 }
   0x3   :  { %12 = vsyncpa [#allocation6 + $0x1], 0 }
   0x4   :  { %13 = vsyncpa [#allocation4], 0 }
   0x5   :  { %15 = vsyncpa [#allocation4 + $0x1], 0  ;;  %s763_s9 = smov 0   ;;  %s765_s10 = smov 0  }
   0x6   :  { %s767_s11 = smov 0   ;;  %s769_s12 = smov 0  }
   0x7   :  { %s771_s13 = smov 0   ;;  %s773_s14 = smov 0  }
   0x8 LB: > { %s493_s15 = sadd.s32 4294967295, %s741_s14   ;;  %s494_s16 = sadd.s32 4294967294, %s741_s14   ;;  %s741_s14 = sphi %s773_s14, %s21_s14   ;;  %s737_s13 = sphi %s771_s13, %s1032_s13   ;;  %s733_s12 = sphi %s769_s12, %s1031_s12   ;;  %s729_s11 = sphi %s767_s11, %s1030_s11   ;;  %s725_s10 = sphi %s765_s10, %s1029_s10   ;;  %s721_s9 = sphi %s763_s9, %s1028_s9  }
   0x9   : > { %s40_s17 = sadd.s32 1, %s737_s13  ;;  %s51_s18 = sadd.s32 1, %s729_s11 }
   0xa   : > { %p42_p0 = scmp.ge.s32.totalorder %s40_s17, 2  ;;  %p58_p1 = scmp.ne.s32.totalorder %s729_s11, %s725_s10 }
   0xb   : > { %p59_p2 = scmp.eq.s32.totalorder %s741_s14, 0  ;;  %p64_p3 = scmp.ne.s32.totalorder %s725_s10, %s721_s9 }
   0xc   : > { %s1034_s17 = smov (%p42_p0, %s40_s17), 0  ;;  %p65_p5 = scmp.eq.s32.totalorder %s493_s15, 0 }
   0xd   : > { %p804_p4 = por %p59_p2, %p58_p1  ;;  %s46_s20 = ssub.s32 %s737_s13, %s1034_s17 }
   0xe   : > { %p120_p6 = scmp.eq.s32.totalorder %s493_s15, 1  ;;  %p49_p7 = scmp.eq.s32.totalorder %s46_s20, 0 }
   0xf   : > { %p810_p8 = por %p65_p5, %p64_p3  ;;  %p126_p10 = scmp.eq.s32.totalorder %s494_s16, 1 }
  0x10   : > { %p814_p9 = por %p120_p6, %p58_p1  ;;  %p532_p13 = scmp.lt.s32.totalorder %s741_s14, 2 }
  0x11   : > { %s1014_s21 = scalar_select %p810_p8, 1, 0 }
  0x12   : > { %s1015_s22 = scalar_select %p814_p9, 1, 0 }
  0x13   : > { %s819_s23 = scalar_select %p49_p7, %s729_s11, %s51_s18  }
  0x14   : > { %p821_p11 = por %p126_p10, %p64_p3  ;;  %s828_s25 = sand.u32 1, %s729_s11  }
  0x15   : > { %s497_s26 = sshll.u32 %s828_s25, 3  ;;  %s512_s27 = sshll.u32 %s737_s13, 7 }
  0x16   : > { %s1016_s24 = scalar_select %p821_p11, 1, 0 }
  0x17   : > { %s835_s30 = scalar_lea.hbm %s1008_s0, %s512_s27  ;;  %s150_s3 = scalar_lea.vmem [#allocation2], %s497_s26 }
  0x18   : > { %s161_s4 = sshll.u32 %s150_s3, 4  ;;  %p841_p0 = pnand %p532_p13, %p804_p4  ;;  %s837_s4 = int_to_ptr.vmem [resolvable:$true] %s161_s4 }
  0x19   : > { %s147_s6 = scalar_lea.sflag [#allocation3], %s828_s25  ;;  %s595_s7 = scalar_lea.hbm %s835_s30, 128 }
  0x1a   : > { %p596_p3 = scmp.ne.s32.totalorder %s835_s30, %s595_s7  ;;  %p597_p5 = pneg %p841_p0 }
  0x1b   : > { %s600_s16 = scalar_lea.hbm %s1008_s0, 256  ;;  %p601_p4 = scmp.lt.u32.totalorder %s835_s30, %s1008_s0 }
  0x1c   : > { %p598_p6 = pnand %p597_p5, %p596_p3  ;;  %p602_p10 = scmp.lt.u32.totalorder %s600_s16, %s595_s7 }
  0x1d   : > { %p604_p12 = scmp.lt.u32.totalorder %s595_s7, %s835_s30 }
  0x1e   : > { %p599_p7 = pneg %p598_p6  ;;  %p603_p13 = por %p602_p10, %p601_p4 }
  0x20   : > { %p605_p1 = por %p604_p12, %p603_p13 }
  0x22   : > { %p606_p2 = pnand %p605_p1, %p599_p7 }
  0x24   : > { %609 = shalt.err (!%p606_p2)
}
  0x25   : > { %s610_s20 = scalar_lea.vmem %s837_s4, 128  ;;  %s743_s26 = smov [#allocation2]  }
  0x26   : > { %p611_p3 = scmp.ne.s32.totalorder %s837_s4, %s610_s20  ;;  %s615_s27 = sshll.u32 %s743_s26, 4  ;;  %s616_s27 = int_to_ptr.vmem [resolvable:$false] %s615_s27 }
  0x27   : > { %s617_s28 = scalar_lea.vmem %s616_s27, 256  ;;  %p618_p9 = scmp.lt.s32.totalorder %s837_s4, %s616_s27 }
  0x28   : > { %p613_p6 = pnand %p611_p3, %p597_p5  ;;  %p619_p4 = scmp.lt.s32.totalorder %s617_s28, %s610_s20 }
  0x2a   : > { %p614_p11 = pneg %p613_p6  ;;  %p620_p10 = por %p619_p4, %p618_p9 }
  0x2c   : > { %p621_p12 = pnand %p620_p10, %p614_p11 }
  0x2e   : > { %624 = shalt.err (!%p621_p12)
}
  0x2f   : > { %524 = dma.hbm_to_vmem [thread:$0]  (!%p841_p0), %s835_s30, 128, %s837_s4, %s147_s6  }
  0x30   : > { %p1018_p1 = scmp.lt.s32.totalorder %s741_s14, 3  ;;  %p1019_p2 = scmp.ge.s32.totalorder %s741_s14, 1 }
  0x31   : > { %s500_s3 = sshll.u32 %s828_s25, 1  ;;  %s513_s7 = sshll.u32 %s737_s13, 5 }
  0x32   : > { %p877_p7 = pnand %p1019_p2, %p1018_p1  ;;  %s886_s16 = scalar_lea.hbm %s1009_s1, %s513_s7 }
  0x33   : > { %s172_s18 = scalar_lea.vmem [#allocation5], %s500_s3  ;;  %s169_s30 = scalar_lea.sflag [#allocation6], %s828_s25 }
  0x34   : > { %s1020_s29 = scalar_select %p877_p7, 1, 0 }
  0x35   : > { %s183_s19 = sshll.u32 %s172_s18, 4  ;;  %s625_s4 = scalar_lea.hbm %s886_s16, 32  ;;  %s184_s19 = int_to_ptr.vmem [resolvable:$true] %s183_s19 }
  0x36   : > { %p626_p9 = scmp.ne.s32.totalorder %s886_s16, %s625_s4  ;;  %s630_s26 = scalar_lea.hbm %s1009_s1, 64 }
  0x37   : > { %p631_p3 = scmp.lt.u32.totalorder %s886_s16, %s1009_s1  ;;  %p632_p6 = scmp.lt.u32.totalorder %s630_s26, %s625_s4 }
  0x38   : > { %p628_p11 = pnand %p626_p9, %p597_p5  ;;  %p634_p10 = scmp.lt.u32.totalorder %s625_s4, %s886_s16 }
  0x39   : > { %p633_p4 = por %p632_p6, %p631_p3 }
  0x3a   : > { %p629_p13 = pneg %p628_p11 }
  0x3b   : > { %p635_p12 = por %p634_p10, %p633_p4 }
  0x3d   : > { %p636_p1 = pnand %p635_p12, %p629_p13 }
  0x3f   : > { %639 = shalt.err (!%p636_p1)
}
  0x40   : > { %s640_s25 = scalar_lea.vmem %s184_s19, 32  ;;  %s744_s3 = smov [#allocation5]  }
  0x41   : > { %p641_p2 = scmp.ne.s32.totalorder %s184_s19, %s640_s25  ;;  %s645_s7 = sshll.u32 %s744_s3, 4  ;;  %s646_s7 = int_to_ptr.vmem [resolvable:$false] %s645_s7 }
  0x42   : > { %s647_s8 = scalar_lea.vmem %s646_s7, 64  ;;  %p648_p8 = scmp.lt.s32.totalorder %s184_s19, %s646_s7 }
  0x43   : > { %p643_p9 = pnand %p641_p2, %p597_p5  ;;  %p649_p7 = scmp.lt.s32.totalorder %s647_s8, %s640_s25 }
  0x45   : > { %p644_p11 = pneg %p643_p9  ;;  %p650_p3 = por %p649_p7, %p648_p8 }
  0x47   : > { %p651_p6 = pnand %p650_p3, %p644_p11 }
  0x49   : > { %654 = shalt.err (!%p651_p6)
}
  0x4a   : > { %527 = dma.hbm_to_vmem [thread:$0]  (!%p841_p0), %s886_s16, 32, %s184_s19, %s169_s30  }
  0x4b   : > { %p1021_p13 = scmp.ne.s32.totalorder %s1020_s29, 0 }
  0x4c   : > { %s911_s15 = sand.u32 (!%p1021_p13), 1, %s725_s10   ;;  %p1022_p5 = scmp.ne.s32.totalorder (!%p1021_p13), %s1014_s21, 0 }
  0x4d   : > { %192 = sbr.rel (%p1021_p13) target bundleno = 190 (0xbe), region = 28  ;;  %s504_s18 = sshll.u32 (!%p1021_p13), %s911_s15, 3 }
  0x4e   : > { %s195_s4 = scalar_lea.sflag (!%p1021_p13), [#allocation3], %s911_s15  ;;  %s198_s6 = scalar_lea.vmem (!%p1021_p13), [#allocation2], %s504_s18 }
  0x54   : > { %708 = dma.done.wait (%p1022_p5), %s195_s4, 128  }
  0x55   : > { %710 = vsyncadd (%p1022_p5), %s195_s4, 4294967168  ;;  %s505_s5 = sshll.u32 %s911_s15, 1  ;;  %s204_s29 = scalar_lea.sflag [#allocation6], %s911_s15 }
  0x56   : > { %s921_s16 = scalar_lea.vmem [#allocation5], %s505_s5 }
  0x57   : > { %712 = dma.done.wait (%p1022_p5), %s204_s29, 32  }
  0x58   : > { %714 = vsyncadd (%p1022_p5), %s204_s29, 4294967264  ;;  %v242_v0 = vlaneseq  ;;  %s931_s19 = scalar_lea.vmem [#allocation7], %s505_s5  ;;  %v745_v2 = vmov 0.0   ;;  %vm252_vm1 = vcmask 1043456   ;;  %v247_v3 = vld [vmem:[%s198_s6] sm:$0xff]  ;;  %s514_s21 = sshll.u32 %s733_s12, 5 }
  0x59   : > { %v250_v4 = vcombine.high %v247_v3, %v247_v3  ;;  %v253_v5 = vsel %vm252_vm1, %v247_v3, -inf  ;;  %v248_v24 = vld [vmem:[%s921_s16] sm:$0x3]  ;;  %s380_s30 = sshll.u32 %s931_s19, 4  ;;  %s956_s27 = scalar_lea.hbm %s1010_s2, %s514_s21  ;;  %s958_s30 = int_to_ptr.vmem [resolvable:$true] %s380_s30 }
  0x5a   : > { %vm927_vm0 = vcmp.lt.s32.totalorder %v242_v0, 256  ;;  %v254_v6 = vrot.slane %v253_v5, 4  ;;  %v938_v21 = vshrl.u32 %v242_v0, 7  ;;  %s365_s28 = scalar_lea.sflag [#allocation4], %s911_s15  ;;  %s655_s25 = scalar_lea.vmem %s958_s30, 32 }
  0x5b   : > { %246 = vst.msk [vmem:[%s931_s19] sm:$0x3] %vm927_vm0, %v745_v2  ;;  %v260_v7 = vsel %vm252_vm1, %v250_v4, -inf  ;;  %p656_p8 = scmp.ne.s32.totalorder %s958_s30, %s655_s25  ;;  %p1025_p0 = scmp.ne.s32.totalorder %s1015_s22, 0 }
  0x5c   : > { %v255_v8 = vmax.f32 %v253_v5, %v254_v6  ;;  %v261_v9 = vrot.slane %v260_v7, 4  ;;  %v295_v23 = vsub.s32 0, %v938_v21  ;;  %v299_v25 = vsub.s32 1, %v938_v21  ;;  %s747_s12 = smov [#allocation7]  }
  0x5d   : > { %p657_p7 = pnand %p656_p8, %p1025_p0  ;;  %s659_s3 = sshll.u32 %s747_s12, 4  ;;  %s660_s3 = int_to_ptr.vmem [resolvable:$false] %s659_s3 }
  0x5e   : > { %v256_v10 = vrot.slane %v255_v8, 2  ;;  %v262_v11 = vmax.f32 %v260_v7, %v261_v9  ;;  %v296_v26 = vrot.slane %v248_v24, %v295_v23  ;;  %v300_v27 = vrot.slane %v248_v24, %v299_v25  ;;  %s661_s7 = scalar_lea.vmem %s660_s3, 64  ;;  %p662_p10 = scmp.lt.s32.totalorder %s958_s30, %s660_s3 }
  0x5f   : > { %v746_v9 = vmov 1966171168   ;;  %p658_p4 = pneg %p657_p7  ;;  %p663_p12 = scmp.lt.s32.totalorder %s661_s7, %s655_s25 }
  0x60   : > { %v257_v12 = vmax.f32 %v255_v8, %v256_v10  ;;  %v263_v13 = vrot.slane %v262_v11, 2  ;;  %vm301_vm2 = vcmp.eq.s32.totalorder %v938_v21, %v296_v26  ;;  %vm302_vm3 = vcmp.eq.s32.totalorder %v938_v21, %v300_v27 }
  0x61   : > { %v344_v10 = vunpack.c.l.s4 %v746_v9  ;;  %p664_p1 = por %p663_p12, %p662_p10 }
  0x62   : > { %v258_v14 = vrot.slane %v257_v12, 1  ;;  %v264_v15 = vmax.f32 %v262_v11, %v263_v13  ;;  %v339_v24 = vld [vmem:[%s931_s19] sm:$0x3] }
  0x63   : > { %p665_p2 = pnand %p664_p1, %p658_p4 }
  0x64   : > { %v259_v16 = vmax.f32 %v257_v12, %v258_v14  ;;  %v265_v17 = vrot.slane %v264_v15, 1 }
  0x66   : > { %v266_v18 = vmax.f32 %v264_v15, %v265_v17  ;;  %v345_v15 = vunpack.c.0.s8 %v344_v10 }
  0x68   : > { %v269_v19 = vcombine.low %v259_v16, %v266_v18 }
  0x6a   : > { %v271_v20 = vsub.f32 %v247_v3, %v269_v19 }
  0x6c   : > { %v272_v22 = vmul.f32 1.442695, %v271_v20  ;;  %v348_v20 = vsub.s32 %v345_v15, %v938_v21 }
  0x6e   : > { %585 = vpow2.f32 %v272_v22 }
  0x78   : > { %v586_v28 = vpop.eup %585 }
  0x79   : > { %v275_v29 = vcombine.high %v586_v28, %v586_v28  ;;  %v277_v30 = vsel %vm252_vm1, %v586_v28, 0.0  ;;  %v303_v31 = vsel %vm301_vm2, %v586_v28, 0.0 }
  0x7a   : > { %v278_v32 = vrot.slane %v277_v30, 4  ;;  %v305_v33 = vsel %vm252_vm1, %v303_v31, 0.0 }
  0x7b   : > { %v284_v34 = vsel %vm252_vm1, %v275_v29, 0.0  ;;  %v304_v35 = vsel %vm302_vm3, %v275_v29, 0.0  ;;  %v306_v36 = vrot.slane %v305_v33, 4 }
  0x7c   : > { %v279_v37 = vadd.f32 %v278_v32, %v277_v30  ;;  %v285_v38 = vrot.slane %v284_v34, 4  ;;  %v312_v39 = vsel %vm252_vm1, %v304_v35, 0.0 }
  0x7d   : > { %v307_v40 = vadd.f32 %v306_v36, %v305_v33  ;;  %v313_v41 = vrot.slane %v312_v39, 4 }
  0x7e   : > { %v280_v42 = vrot.slane %v279_v37, 2  ;;  %v286_v43 = vadd.f32 %v285_v38, %v284_v34 }
  0x7f   : > { %v314_v44 = vadd.f32 %v313_v41, %v312_v39  ;;  %v308_v47 = vrot.slane %v307_v40, 2 }
  0x80   : > { %v281_v45 = vadd.f32 %v280_v42, %v279_v37  ;;  %v287_v46 = vrot.slane %v286_v43, 2 }
  0x81   : > { %v315_v50 = vrot.slane %v314_v44, 2  ;;  %v309_v53 = vadd.f32 %v308_v47, %v307_v40 }
  0x82   : > { %v282_v48 = vrot.slane %v281_v45, 1  ;;  %v288_v49 = vadd.f32 %v287_v46, %v286_v43 }
  0x83   : > { %v316_v55 = vadd.f32 %v315_v50, %v314_v44  ;;  %v310_v56 = vrot.slane %v309_v53, 1 }
  0x84   : > { %v283_v51 = vadd.f32 %v282_v48, %v281_v45  ;;  %v289_v52 = vrot.slane %v288_v49, 1 }
  0x85   : > { %v317_v57 = vrot.slane %v316_v55, 1  ;;  %v311_v58 = vadd.f32 %v310_v56, %v309_v53 }
  0x86   : > { %v290_v54 = vadd.f32 %v289_v52, %v288_v49  ;;  %587 = vrcp.f32 %v283_v51 }
  0x87   : > { %v318_v59 = vadd.f32 %v317_v57, %v316_v55 }
  0x88   : > { %589 = vrcp.f32 %v290_v54 }
  0x90   : > { %v588_v60 = vpop.eup %587 }
  0x91   : > { %v320_v61 = vmul.f32 %v588_v60, %v311_v58 }
  0x92   : > { %v590_v62 = vpop.eup %589 }
  0x93   : > { %v322_v63 = vmul.f32 %v590_v62, %v318_v59  ;;  %v323_v0 = vmax.f32 %v320_v61, 1e-10 }
  0x95   : > { %v324_v2 = vmax.f32 %v322_v63, 1e-10  ;;  %v329_v3 = vadd.f32 1e-10, %v323_v0  ;;  %v325_v5 = vsub.f32 1.0, %v323_v0 }
  0x97   : > { %v330_v4 = vadd.f32 1e-10, %v324_v2  ;;  %591 = vlog2.f32 %v329_v3  ;;  %v326_v6 = vsub.f32 1.0, %v324_v2  ;;  %v327_v7 = vmul.f32 %v325_v5, %v325_v5 }
  0x99   : > { %593 = vlog2.f32 %v330_v4  ;;  %v328_v8 = vmul.f32 %v326_v6, %v326_v6  ;;  %v335_v11 = vmul.f32 -1.0, %v327_v7 }
  0x9b   : > { %v336_v14 = vmul.f32 -1.0, %v328_v8 }
  0xa1   : > { %v592_v12 = vpop.eup %591 }
  0xa2   : > { %v332_v13 = vmul.f32 0.6931472, %v592_v12 }
  0xa3   : > { %v594_v16 = vpop.eup %593 }
  0xa4   : > { %v334_v17 = vmul.f32 0.6931472, %v594_v16  ;;  %v337_v18 = vmul.f32 %v335_v11, %v332_v13 }
  0xa6   : > { %v338_v19 = vmul.f32 %v336_v14, %v334_v17 }
  0xa8   : > { %v342_v22 = vcombine.low %v337_v18, %v338_v19 }
  0xaa   : > { %v349_v23 = vrot.slane %v342_v22, %v348_v20 }
  0xac   : > { %v356_v25 = vrot.slane %v349_v23, %v348_v20 }
  0xae   : > { %v358_v26 = vadd.f32 %v356_v25, %v339_v24 }
  0xb0   : > { %363 = vst.msk [vmem:[%s931_s19] sm:$0x3] %vm927_vm0, %v358_v26 }
  0xb1   : > { %668 = shalt.err (!%p665_p2)
}
  0xb2   : > { %s669_s8 = scalar_lea.hbm %s956_s27, 32  ;;  %s673_s4 = scalar_lea.hbm %s1010_s2, 64 }
  0xb3   : > { %p670_p9 = scmp.ne.s32.totalorder %s956_s27, %s669_s8  ;;  %p674_p6 = scmp.lt.u32.totalorder %s956_s27, %s1010_s2 }
  0xb4   : > { %p675_p13 = scmp.lt.u32.totalorder %s673_s4, %s669_s8  ;;  %p677_p8 = scmp.lt.u32.totalorder %s669_s8, %s956_s27 }
  0xb5   : > { %p671_p11 = pnand %p670_p9, %p1025_p0 }
  0xb6   : > { %p676_p5 = por %p675_p13, %p674_p6 }
  0xb7   : > { %p672_p3 = pneg %p671_p11 }
  0xb8   : > { %p678_p7 = por %p677_p8, %p676_p5 }
  0xba   : > { %p679_p4 = pnand %p678_p7, %p672_p3 }
  0xbc   : > { %682 = shalt.err (!%p679_p4)
}
  0xbd   : > { %519 = dma.vmem_to_hbm [thread:$0]  (%p1025_p0), %s958_s30, 32, %s956_s27, %s365_s28  }
  0xbe PF: > { %s392_s29 = sand.u32 1, %s721_s9   ;;  %p1026_p10 = scmp.ne.s32.totalorder %s1016_s24, 0 }
  0xbf   : > { %p1027_p12 = scmp.ge.s32.totalorder %s741_s14, 2  ;;  %s393_s16 = scalar_lea.sflag [#allocation4], %s392_s29 }
  0xc1   : > { %p529_p1 = pnand %p1027_p12, %p1026_p10 }
  0xc3   : > { %716 = dma.done.wait (!%p529_p1), %s393_s16, 32  }
  0xc4   : > { %718 = vsyncadd (!%p529_p1), %s393_s16, 4294967264  ;;  %s21_s14 = sadd.s32 1, %s741_s14   ;;  %s1028_s9 = smov %s725_s10 }
  0xc5   : > { %p18_p2 = scmp.ge.s32.totalorder %s21_s14, 4   ;;  %s1029_s10 = smov %s729_s11 }
  0xc6   : > { %s1030_s11 = smov %s819_s23  ;;  %s1031_s12 = smov %s737_s13 }
  0xc7   : > { %s1032_s13 = smov %s1034_s17  ;;  %20 = sbr.rel (!%p18_p2) target bundleno = 8 (0x8), region = 90 }
  0xce   :  { %398 = vsyncpa [#allocation3], 1 }
  0xcf   :  { %400 = vsyncpa [#allocation3 + $0x1], 1 }
  0xd0   :  { %401 = vsyncpa [#allocation6], 1 }
  0xd1   :  { %403 = vsyncpa [#allocation6 + $0x1], 1 }
  0xd2   :  { %404 = vsyncpa [#allocation4], 1 }
  0xd3   :  { %406 = vsyncpa [#allocation4 + $0x1], 1 }

</bundles_post_ra>
